<compile_context>
chip_gen: v5e
topology: v5e:2x2
jax: 0.10.0
libtpu: 0.0.40
codegen_flags: <defaults>
</compile_context>

<pallas_src>
from functools import partial

import numpy as np
import jax
import jax.numpy as jnp
from jax.experimental import pallas as pl
from jax.experimental.pallas import tpu as pltpu


# ----------------------------- Pallas kernel --------------------------------
def _phase2_loss_kernel(pred_ref, targ_ref, slab_ref, out_ref):
    """Per-tile streaming reduce + one-shot parameter epilogue.

    pred_ref : VMEM f32[TILE_N, T]   (tile of predicted signals)
    targ_ref : VMEM f32[TILE_N, T]   (tile of target signals)
    slab_ref : VMEM f32[8, N_slab]   rows 0..2 seasonal amps (q, semi, annual),
                                     rows 3..5 neighbor-weighted means,
                                     row  6    spatial mixing weights,
                                     row  7    zero padding.  Resident block.
    out_ref  : VMEM f32[1, 8, 128]   lane-dense partial-sum row:
                 [0,0,0] = sum(diff^2)            (this tile)
                 [0,0,1] = sum(grad-diff^2)       (this tile)
                 [0,0,2] = spatial consistency sum   (tile 0 only)
                 [0,0,3] = seasonal pattern relu sum (tile 0 only)
                 [0,0,4] = seasonal penalty relu sum (tile 0 only)
    """
    i = pl.program_id(0)

    pred = pred_ref[...]                       # [TILE_N, T]
    targ = targ_ref[...]
    t = pred.shape[-1]

    # --- MSE partial sum ------------------------------------------------------
    diff = pred - targ
    mse_part = jnp.sum(diff * diff)

    # --- shape-similarity partial sum (temporal gradient MSE) ----------------
    # (pred[:,1:]-pred[:,:-1]) - (targ[:,1:]-targ[:,:-1]) == diff[:,1:]-diff[:,:-1].
    # roll by (t-1) == roll by -1: column j holds diff[:, j+1]; mask the wrapped
    # last column instead of materializing two unaligned (t-1)-wide slices.
    rolled = pltpu.roll(diff, shift=t - 1, axis=1)
    gdiff = rolled - diff
    col = jax.lax.broadcasted_iota(jnp.int32, diff.shape, 1)
    gdiff = jnp.where(col < (t - 1), gdiff, 0.0)
    shape_part = jnp.sum(gdiff * gdiff)

    # --- lane-dense per-tile output row ---------------------------------------
    lane = jax.lax.broadcasted_iota(jnp.int32, (1, 8, 128), 2)
    sub = jax.lax.broadcasted_iota(jnp.int32, (1, 8, 128), 1)
    first_row = sub == 0
    row = jnp.where(first_row & (lane == 0), mse_part, 0.0)
    row = jnp.where(first_row & (lane == 1), shape_part, row)
    out_ref[...] = row

    # --- spatial / seasonal epilogue: per-kernel work, run exactly once -------
    @pl.when(i == 0)
    def _():
        slab = slab_ref[...]                   # [8, N_slab]
        amps = slab[0:3, :]                    # seasonal amplitudes
        wmean = slab[3:6, :]                   # neighbor-weighted means
        sw = slab[6:7, :]                      # spatial mixing weights

        consistency = (amps - wmean) ** 2
        factor = 1.0 - jax.nn.sigmoid(sw)
        spatial_sum = jnp.sum(consistency * factor)

        quarterly = slab[0:1, :]
        semi_annual = slab[1:2, :]
        annual = slab[2:3, :]
        pattern_sum = jnp.sum(jnp.maximum(semi_annual - 1.2 * annual, 0.0))
        penalty_sum = jnp.sum(
            jnp.maximum(quarterly + semi_annual + annual - 60.0, 0.0))

        extra = jnp.where(first_row & (lane == 2), spatial_sum, 0.0)
        extra = jnp.where(first_row & (lane == 3), pattern_sum, extra)
        extra = jnp.where(first_row & (lane == 4), penalty_sum, extra)
        out_ref[...] = out_ref[...] + extra


# --------------------------- tile-size selection -------------------------------
def _auto_tile_n(n, t):
    """Station-axis tile: multiple of 8, f32 tile <= ~2 MiB (v7x VMEM headroom)."""
    bytes_per_row = 4 * t
    cap_rows = max(8, ((2 << 20) // bytes_per_row) // 8 * 8)
    n_up = ((n + 7) // 8) * 8
    return int(max(8, min(cap_rows, 256, n_up)))


# ------------------------------ jitted core -----------------------------------
@partial(jax.jit, static_argnames=("tile_n",))
def _phase2_loss_device(predicted, target, seasonal_amplitudes, spatial_weights,
                        neighbor_indices, neighbor_weights, alphas, *, tile_n):
    n, t = predicted.shape

    pred = predicted.astype(jnp.float32)
    targ = target.astype(jnp.float32)
    amps = seasonal_amplitudes.astype(jnp.float32)                 # [N, 3]

    # Data-dependent neighbor gather + weighting stays in the XLA glue (one
    # small gather/einsum); the kernel only ever sees the [3, N] weighted mean.
    gathered = jnp.take(amps, neighbor_indices, axis=0)            # [N, K, 3]
    wmean = jnp.einsum('nkc,nk->nc', gathered,
                       neighbor_weights.astype(jnp.float32))       # [N, 3]

    # Pad stations to a tile multiple. Zero rows contribute exactly zero to the
    # sums; the means below divide by the true n.
    n_pad = ((n + tile_n - 1) // tile_n) * tile_n
    if n_pad != n:
        pred = jnp.pad(pred, ((0, n_pad - n), (0, 0)))
        targ = jnp.pad(targ, ((0, n_pad - n), (0, 0)))
    num_tiles = n_pad // tile_n

    # One lane-dense [8, N_slab] parameter slab (single small DMA, resident).
    # Padded lanes are zero -> contribute zero to spatial/seasonal sums.
    n_slab = ((n + 127) // 128) * 128
    slab = jnp.zeros((8, n_slab), jnp.float32)
    slab = slab.at[0:3, :n].set(amps.T)
    slab = slab.at[3:6, :n].set(wmean.T)
    slab = slab.at[6, :n].set(spatial_weights.astype(jnp.float32))

    grid_spec = pltpu.PrefetchScalarGridSpec(
        num_scalar_prefetch=0,
        grid=(num_tiles,),
        in_specs=[
            pl.BlockSpec((tile_n, t), lambda i: (i, 0)),          # pred tile
            pl.BlockSpec((tile_n, t), lambda i: (i, 0)),          # targ tile
            pl.BlockSpec((8, n_slab), lambda i: (0, 0)),          # resident slab
        ],
        out_specs=pl.BlockSpec((1, 8, 128), lambda i: (i, 0, 0)), # lane-dense partials
    )

    partials = pl.pallas_call(
        _phase2_loss_kernel,
        out_shape=jax.ShapeDtypeStruct((num_tiles, 8, 128), jnp.float32),
        grid_spec=grid_spec,
        compiler_params=pltpu.CompilerParams(
            dimension_semantics=("parallel",)),
        cost_estimate=pl.CostEstimate(
            flops=7 * n_pad * t,
            transcendentals=n_slab,
            bytes_accessed=2 * 4 * n_pad * t + 4 * 8 * n_slab
                           + 4 * num_tiles * 8 * 128),
    )(pred, targ, slab)

    # Tiny final combine in XLA glue (keeps the grid axis fully parallel).
    mse_sum = jnp.sum(partials[:, 0, 0])
    shape_sum = jnp.sum(partials[:, 0, 1])
    spatial_sum = partials[0, 0, 2]
    pattern_sum = partials[0, 0, 3]
    penalty_sum = partials[0, 0, 4]

    mse = mse_sum / (n * t)
    shape_l = shape_sum / (n * (t - 1))
    spatial_l = spatial_sum / (3.0 * n)
    seasonal_l = pattern_sum / n + 0.1 * (penalty_sum / n)
    total = mse + alphas[0] * shape_l + alphas[1] * spatial_l + alphas[2] * seasonal_l
    return jnp.stack([mse, shape_l, spatial_l, seasonal_l, total])


# ------------------------------ wrapper ----------------------------------------
def phase2_optimized_loss(predicted, target, seasonal_amplitudes, spatial_weights,
                          neighbor_indices, neighbor_weights, epoch=0, tile_n=None):
    """Pallas implementation of Phase2OptimizedLoss.forward.

    predicted, target:   [N, T] f32
    seasonal_amplitudes: [N, 3] f32    (model.seasonal_amplitudes)
    spatial_weights:     [N]    f32    (model.spatial_weights)
    neighbor_indices:    [N, K] int32  (model.neighbor_graph['indices'])
    neighbor_weights:    [N, K] f32    (model.neighbor_graph['weights'])
    Returns (total_loss jnp scalar, dict of jnp-scalar components) -- no host sync.
    """
    n, t = predicted.shape
    if tile_n is None:
        tile_n = _auto_tile_n(n, t)

    warmup_epochs = 100
    if epoch < warmup_epochs:
        alpha_shape = alpha_spatial = alpha_seasonal = 0.05
    else:
        progress = min((epoch - warmup_epochs) / 1000.0, 1.0)
        alpha_shape = 0.1 + 0.1 * progress
        alpha_spatial = 0.1 + 0.05 * progress
        alpha_seasonal = 0.1 + 0.1 * progress
    # Runtime scalars -> no recompilation when epoch (and hence alphas) change.
    alphas = jnp.asarray([alpha_shape, alpha_spatial, alpha_seasonal], jnp.float32)

    out = _phase2_loss_device(predicted, target, seasonal_amplitudes,
                              spatial_weights, neighbor_indices,
                              neighbor_weights, alphas, tile_n=int(tile_n))

    components = {
        "mse": out[0],
        "shape": out[1],
        "spatial": out[2],
        "seasonal": out[3],
        "total": out[4],
    }
    return out[4], components


# ---------------------- pure-JAX reference (for checking) ----------------------
def _reference_loss(predicted, target, amps, sw, nbr_idx, nbr_w, epoch=0):
    n, t = predicted.shape
    mse = jnp.mean((predicted - target) ** 2)
    pg = predicted[:, 1:] - predicted[:, :-1]
    tg = target[:, 1:] - target[:, :-1]
    shape_l = jnp.mean((pg - tg) ** 2)
    gath = amps[nbr_idx]                                  # [N, K, 3]
    wmean = jnp.sum(gath * nbr_w[:, :, None], axis=1)     # [N, 3]
    cons = (amps - wmean) ** 2
    factor = 1.0 - jax.nn.sigmoid(sw)
    spatial_l = jnp.sum(cons * factor[:, None]) / (n * 3)
    quarterly, semi, annual = amps[:, 0], amps[:, 1], amps[:, 2]
    pattern = jnp.mean(jax.nn.relu(semi - 1.2 * annual))
    penalty = jnp.mean(jax.nn.relu(quarterly + semi + annual - 60.0))
    seasonal_l = pattern + 0.1 * penalty
    a = 0.05
    total = mse + a * shape_l + a * spatial_l + a * seasonal_l
    return total, mse, shape_l, spatial_l, seasonal_l


# ------------------------------ main --------------------------------------------
if __name__ == "__main__":
    N_STATIONS = 40          # not a tile multiple -> exercises the zero-pad path
    N_TIMEPOINTS = 64
    N_NEIGHBORS = 8

    key = jax.random.PRNGKey(0)
    k_pred, k_targ, k_amp, k_sw = jax.random.split(key, 4)

    # Inputs to the loss (predicted / target signals).
    predicted = jax.random.normal(k_pred, (N_STATIONS, N_TIMEPOINTS), jnp.float32) * 5.0
    target = jax.random.normal(k_targ, (N_STATIONS, N_TIMEPOINTS), jnp.float32) * 5.0

    # Model parameters (range chosen so pattern/penalty relu terms are non-zero).
    seasonal_amplitudes = jax.random.uniform(
        k_amp, (N_STATIONS, 3), jnp.float32, minval=5.0, maxval=30.0)
    spatial_weights = jnp.ones((N_STATIONS,), jnp.float32) * 0.15

    # Neighbor graph (replaces sklearn NearestNeighbors, deterministic numpy).
    rng = np.random.RandomState(0)
    coords = rng.rand(N_STATIONS, 2).astype(np.float64)
    dmat = np.sqrt(((coords[:, None, :] - coords[None, :, :]) ** 2).sum(-1))
    order = np.argsort(dmat, axis=1)
    nbr_idx_np = order[:, 1:N_NEIGHBORS + 1]                          # exclude self
    nbr_dist_np = np.take_along_axis(dmat, nbr_idx_np, axis=1)
    w_np = np.exp(-nbr_dist_np / np.median(nbr_dist_np))
    w_np = w_np / (np.sum(w_np, axis=1, keepdims=True) + 1e-6)
    neighbor_indices = jnp.asarray(nbr_idx_np, jnp.int32)
    neighbor_weights = jnp.asarray(w_np, jnp.float32)

    # Main path: explicit tile_n=16 -> 3-step grid (40 -> 48 padded stations).
    total_loss, components = phase2_optimized_loss(
        predicted, target, seasonal_amplitudes, spatial_weights,
        neighbor_indices, neighbor_weights, epoch=0, tile_n=16)
    total_loss = jax.block_until_ready(total_loss)

    # Cross-check against pure-JAX reference (host conversion only in the test).
    ref_total, ref_mse, ref_shape, ref_spatial, ref_seasonal = _reference_loss(
        predicted, target, seasonal_amplitudes, spatial_weights,
        neighbor_indices, neighbor_weights, epoch=0)
    np.testing.assert_allclose(float(total_loss), float(ref_total), rtol=1e-4, atol=1e-5)
    np.testing.assert_allclose(float(components["mse"]), float(ref_mse), rtol=1e-4, atol=1e-5)
    np.testing.assert_allclose(float(components["shape"]), float(ref_shape), rtol=1e-4, atol=1e-5)
    np.testing.assert_allclose(float(components["spatial"]), float(ref_spatial), rtol=1e-4, atol=1e-5)
    np.testing.assert_allclose(float(components["seasonal"]), float(ref_seasonal), rtol=1e-4, atol=1e-5)

    # Auto tile-size path (single-tile grid) must match too.
    total_auto, _ = phase2_optimized_loss(
        predicted, target, seasonal_amplitudes, spatial_weights,
        neighbor_indices, neighbor_weights, epoch=0)
    np.testing.assert_allclose(float(jax.block_until_ready(total_auto)),
                               float(ref_total), rtol=1e-4, atol=1e-5)

    # Call again post-warmup: alphas change but nothing recompiles (runtime arg).
    total_loss2, _ = phase2_optimized_loss(
        predicted, target, seasonal_amplitudes, spatial_weights,
        neighbor_indices, neighbor_weights, epoch=500, tile_n=16)
    jax.block_until_ready(total_loss2)

    print("KERNEL_OK")
</pallas_src>

<mosaic_0001>
module attributes {stable_mosaic.version = 11 : i64} {
  func.func @_phase2_loss_kernel(%arg0: i32, %arg1: memref<16x64xf32, #tpu.memory_space<vmem>>, %arg2: memref<16x64xf32, #tpu.memory_space<vmem>>, %arg3: memref<8x128xf32, #tpu.memory_space<vmem>>, %arg4: memref<1x8x128xf32, #tpu.memory_space<vmem>>) attributes {dimension_semantics = [#tpu.dimension_semantics<parallel>], iteration_bounds = array<i64: 3>, scalar_prefetch = 0 : i64, scratch_operands = 0 : i64, tpu.core_type = #tpu.core_type<tc>, window_params = [{transform_indices = @transform_0, window_bounds = array<i64: 16, 64>}, {transform_indices = @transform_1, window_bounds = array<i64: 16, 64>}, {pipeline_mode = #tpu.pipeline_mode<synchronous>, transform_indices = @transform_2, window_bounds = array<i64: 8, 128>}, {transform_indices = @transform_3, window_bounds = array<i64: 1, 8, 128>}]} {
    %c0 = arith.constant 0 : index
    %c0_0 = arith.constant 0 : index
    %0 = vector.load %arg1[%c0, %c0_0] : memref<16x64xf32, #tpu.memory_space<vmem>>, vector<16x64xf32>
    %c0_1 = arith.constant 0 : index
    %c0_2 = arith.constant 0 : index
    %1 = vector.load %arg2[%c0_1, %c0_2] : memref<16x64xf32, #tpu.memory_space<vmem>>, vector<16x64xf32>
    %2 = arith.subf %0, %1 : vector<16x64xf32>
    %3 = arith.mulf %2, %2 : vector<16x64xf32>
    %4 = vector.shape_cast %3 : vector<16x64xf32> to vector<1x16x64xf32>
    %cst = arith.constant dense<0.000000e+00> : vector<1xf32>
    %5 = vector.multi_reduction <add>, %4, %cst [1, 2] : vector<1x16x64xf32> to vector<1xf32>
    %6 = vector.shape_cast %5 : vector<1xf32> to vector<1x1x1xf32>
    %7 = vector.extract %6[0, 0, 0] : f32 from vector<1x1x1xf32>
    %c63_i32 = arith.constant 63 : i32
    %8 = tpu.dynamic_rotate %2 by %c63_i32 dim 1 : vector<16x64xf32>, i32 -> vector<16x64xf32>
    %9 = arith.subf %8, %2 : vector<16x64xf32>
    %10 = tpu.iota {dimensions = array<i32: 1>} : vector<16x64xi32>
    %c63_i32_3 = arith.constant 63 : i32
    %11 = vector.broadcast %c63_i32_3 : i32 to vector<16x64xi32>
    %12 = arith.cmpi slt, %10, %11 : vector<16x64xi32>
    %cst_4 = arith.constant 0.000000e+00 : f32
    %13 = vector.broadcast %cst_4 : f32 to vector<16x64xf32>
    %14 = arith.select %12, %9, %13 : vector<16x64xi1>, vector<16x64xf32>
    %15 = arith.mulf %14, %14 : vector<16x64xf32>
    %16 = vector.shape_cast %15 : vector<16x64xf32> to vector<1x16x64xf32>
    %cst_5 = arith.constant dense<0.000000e+00> : vector<1xf32>
    %17 = vector.multi_reduction <add>, %16, %cst_5 [1, 2] : vector<1x16x64xf32> to vector<1xf32>
    %18 = vector.shape_cast %17 : vector<1xf32> to vector<1x1x1xf32>
    %19 = vector.extract %18[0, 0, 0] : f32 from vector<1x1x1xf32>
    %20 = tpu.iota {dimensions = array<i32: 2>} : vector<1x8x128xi32>
    %21 = tpu.iota {dimensions = array<i32: 1>} : vector<1x8x128xi32>
    %c0_i32 = arith.constant 0 : i32
    %22 = vector.broadcast %c0_i32 : i32 to vector<1x8x128xi32>
    %23 = arith.cmpi eq, %21, %22 : vector<1x8x128xi32>
    %c0_i32_6 = arith.constant 0 : i32
    %24 = vector.broadcast %c0_i32_6 : i32 to vector<1x8x128xi32>
    %25 = arith.cmpi eq, %20, %24 : vector<1x8x128xi32>
    %26 = arith.andi %23, %25 : vector<1x8x128xi1>
    %cst_7 = arith.constant 0.000000e+00 : f32
    %27 = vector.broadcast %7 : f32 to vector<1x8x128xf32>
    %28 = vector.broadcast %cst_7 : f32 to vector<1x8x128xf32>
    %29 = arith.select %26, %27, %28 : vector<1x8x128xi1>, vector<1x8x128xf32>
    %c1_i32 = arith.constant 1 : i32
    %30 = vector.broadcast %c1_i32 : i32 to vector<1x8x128xi32>
    %31 = arith.cmpi eq, %20, %30 : vector<1x8x128xi32>
    %32 = arith.andi %23, %31 : vector<1x8x128xi1>
    %33 = vector.broadcast %19 : f32 to vector<1x8x128xf32>
    %34 = arith.select %32, %33, %29 : vector<1x8x128xi1>, vector<1x8x128xf32>
    %c0_8 = arith.constant 0 : index
    %c0_9 = arith.constant 0 : index
    %c0_10 = arith.constant 0 : index
    %35 = vector.load %arg4[%c0_8, %c0_9, %c0_10] : memref<1x8x128xf32, #tpu.memory_space<vmem>>, vector<1x8x128xf32>
    tpu.vector_store %arg4[%c0_8, %c0_9, %c0_10], %34 {strides = array<i32>} : memref<1x8x128xf32, #tpu.memory_space<vmem>>, vector<1x8x128xf32>,
    %c0_i32_11 = arith.constant 0 : i32
    %36 = arith.cmpi eq, %arg0, %c0_i32_11 : i32
    %37 = arith.extui %36 : i1 to i32
    %c0_i32_12 = arith.constant 0 : i32
    %38 = arith.cmpi ne, %37, %c0_i32_12 : i32
    scf.if %38 {
      %c0_13 = arith.constant 0 : index
      %c0_14 = arith.constant 0 : index
      %39 = vector.load %arg3[%c0_13, %c0_14] : memref<8x128xf32, #tpu.memory_space<vmem>>, vector<8x128xf32>
      %40 = vector.extract_strided_slice %39 {offsets = [0, 0], sizes = [3, 128], strides = [1, 1]} : vector<8x128xf32> to vector<3x128xf32>
      %41 = vector.extract_strided_slice %39 {offsets = [3, 0], sizes = [3, 128], strides = [1, 1]} : vector<8x128xf32> to vector<3x128xf32>
      %42 = vector.extract_strided_slice %39 {offsets = [6, 0], sizes = [1, 128], strides = [1, 1]} : vector<8x128xf32> to vector<1x128xf32>
      %43 = arith.subf %40, %41 : vector<3x128xf32>
      %44 = arith.mulf %43, %43 : vector<3x128xf32>
      %45 = arith.negf %42 : vector<1x128xf32>
      %46 = math.exp %45 : vector<1x128xf32>
      %cst_15 = arith.constant 1.000000e+00 : f32
      %47 = vector.broadcast %cst_15 : f32 to vector<1x128xf32>
      %48 = arith.addf %47, %46 : vector<1x128xf32>
      %49 = arith.divf %47, %48 : vector<1x128xf32>
      %cst_16 = arith.constant 1.000000e+00 : f32
      %50 = vector.broadcast %cst_16 : f32 to vector<1x128xf32>
      %51 = arith.subf %50, %49 : vector<1x128xf32>
      %52 = vector.broadcast %51 : vector<1x128xf32> to vector<3x128xf32>
      %53 = arith.mulf %44, %52 : vector<3x128xf32>
      %54 = vector.shape_cast %53 : vector<3x128xf32> to vector<1x3x128xf32>
      %cst_17 = arith.constant dense<0.000000e+00> : vector<1xf32>
      %55 = vector.multi_reduction <add>, %54, %cst_17 [1, 2] : vector<1x3x128xf32> to vector<1xf32>
      %56 = vector.shape_cast %55 : vector<1xf32> to vector<1x1x1xf32>
      %57 = vector.extract %56[0, 0, 0] : f32 from vector<1x1x1xf32>
      %58 = vector.extract_strided_slice %39 {offsets = [0, 0], sizes = [1, 128], strides = [1, 1]} : vector<8x128xf32> to vector<1x128xf32>
      %59 = vector.extract_strided_slice %39 {offsets = [1, 0], sizes = [1, 128], strides = [1, 1]} : vector<8x128xf32> to vector<1x128xf32>
      %60 = vector.extract_strided_slice %39 {offsets = [2, 0], sizes = [1, 128], strides = [1, 1]} : vector<8x128xf32> to vector<1x128xf32>
      %cst_18 = arith.constant 1.200000e+00 : f32
      %61 = vector.broadcast %cst_18 : f32 to vector<1x128xf32>
      %62 = arith.mulf %61, %60 : vector<1x128xf32>
      %63 = arith.subf %59, %62 : vector<1x128xf32>
      %cst_19 = arith.constant 0.000000e+00 : f32
      %64 = vector.broadcast %cst_19 : f32 to vector<1x128xf32>
      %65 = arith.maximumf %63, %64 : vector<1x128xf32>
      %66 = vector.shape_cast %65 : vector<1x128xf32> to vector<1x1x128xf32>
      %cst_20 = arith.constant dense<0.000000e+00> : vector<1xf32>
      %67 = vector.multi_reduction <add>, %66, %cst_20 [1, 2] : vector<1x1x128xf32> to vector<1xf32>
      %68 = vector.shape_cast %67 : vector<1xf32> to vector<1x1x1xf32>
      %69 = vector.extract %68[0, 0, 0] : f32 from vector<1x1x1xf32>
      %70 = arith.addf %58, %59 : vector<1x128xf32>
      %71 = arith.addf %70, %60 : vector<1x128xf32>
      %cst_21 = arith.constant 6.000000e+01 : f32
      %72 = vector.broadcast %cst_21 : f32 to vector<1x128xf32>
      %73 = arith.subf %71, %72 : vector<1x128xf32>
      %cst_22 = arith.constant 0.000000e+00 : f32
      %74 = vector.broadcast %cst_22 : f32 to vector<1x128xf32>
      %75 = arith.maximumf %73, %74 : vector<1x128xf32>
      %76 = vector.shape_cast %75 : vector<1x128xf32> to vector<1x1x128xf32>
      %cst_23 = arith.constant dense<0.000000e+00> : vector<1xf32>
      %77 = vector.multi_reduction <add>, %76, %cst_23 [1, 2] : vector<1x1x128xf32> to vector<1xf32>
      %78 = vector.shape_cast %77 : vector<1xf32> to vector<1x1x1xf32>
      %79 = vector.extract %78[0, 0, 0] : f32 from vector<1x1x1xf32>
      %c2_i32 = arith.constant 2 : i32
      %80 = vector.broadcast %c2_i32 : i32 to vector<1x8x128xi32>
      %81 = arith.cmpi eq, %20, %80 : vector<1x8x128xi32>
      %82 = arith.andi %23, %81 : vector<1x8x128xi1>
      %cst_24 = arith.constant 0.000000e+00 : f32
      %83 = vector.broadcast %57 : f32 to vector<1x8x128xf32>
      %84 = vector.broadcast %cst_24 : f32 to vector<1x8x128xf32>
      %85 = arith.select %82, %83, %84 : vector<1x8x128xi1>, vector<1x8x128xf32>
      %c3_i32 = arith.constant 3 : i32
      %86 = vector.broadcast %c3_i32 : i32 to vector<1x8x128xi32>
      %87 = arith.cmpi eq, %20, %86 : vector<1x8x128xi32>
      %88 = arith.andi %23, %87 : vector<1x8x128xi1>
      %89 = vector.broadcast %69 : f32 to vector<1x8x128xf32>
      %90 = arith.select %88, %89, %85 : vector<1x8x128xi1>, vector<1x8x128xf32>
      %c4_i32 = arith.constant 4 : i32
      %91 = vector.broadcast %c4_i32 : i32 to vector<1x8x128xi32>
      %92 = arith.cmpi eq, %20, %91 : vector<1x8x128xi32>
      %93 = arith.andi %23, %92 : vector<1x8x128xi1>
      %94 = vector.broadcast %79 : f32 to vector<1x8x128xf32>
      %95 = arith.select %93, %94, %90 : vector<1x8x128xi1>, vector<1x8x128xf32>
      %c0_25 = arith.constant 0 : index
      %c0_26 = arith.constant 0 : index
      %c0_27 = arith.constant 0 : index
      %96 = vector.load %arg4[%c0_25, %c0_26, %c0_27] : memref<1x8x128xf32, #tpu.memory_space<vmem>>, vector<1x8x128xf32>
      %97 = arith.addf %96, %95 : vector<1x8x128xf32>
      %c0_28 = arith.constant 0 : index
      %c0_29 = arith.constant 0 : index
      %c0_30 = arith.constant 0 : index
      %98 = vector.load %arg4[%c0_28, %c0_29, %c0_30] : memref<1x8x128xf32, #tpu.memory_space<vmem>>, vector<1x8x128xf32>
      tpu.vector_store %arg4[%c0_28, %c0_29, %c0_30], %97 {strides = array<i32>} : memref<1x8x128xf32, #tpu.memory_space<vmem>>, vector<1x8x128xf32>,
    } else {
    }
    return
  }
  func.func @transform_0(%arg0: i32) -> (i32, i32) {
    %c0_i32 = arith.constant 0 : i32
    %c0_i32_0 = arith.constant 0 : i32
    return %arg0, %c0_i32 : i32, i32
  }
  func.func @transform_1(%arg0: i32) -> (i32, i32) {
    %c0_i32 = arith.constant 0 : i32
    %c0_i32_0 = arith.constant 0 : i32
    return %arg0, %c0_i32 : i32, i32
  }
  func.func @transform_2(%arg0: i32) -> (i32, i32) {
    %c0_i32 = arith.constant 0 : i32
    %c0_i32_0 = arith.constant 0 : i32
    %c0_i32_1 = arith.constant 0 : i32
    return %c0_i32, %c0_i32_0 : i32, i32
  }
  func.func @transform_3(%arg0: i32) -> (i32, i32, i32) {
    %c0_i32 = arith.constant 0 : i32
    %c0_i32_0 = arith.constant 0 : i32
    %c0_i32_1 = arith.constant 0 : i32
    return %arg0, %c0_i32, %c0_i32_0 : i32, i32, i32
  }
}

</mosaic_0001>

<bundles_post_ra>
// kernel: _phase2_loss_device.1
= control target key start
LH: loop header
LB: loop body
LE: loop exit
PB: predicated region body
PF: predicated region fallthrough
CT: control target
= control target key end

     0   :  { %s508_s12 = smov 0   ;;  %s565_s0 = inlined_call_operand.vmem [shape: f32[48,64], index: 0, kind: input, shape index: {}]   ;;  %s566_s1 = inlined_call_operand.vmem [shape: f32[48,64], index: 1, kind: input, shape index: {}]   ;;  %s567_s2 = inlined_call_operand.vmem [shape: f32[8,128], index: 2, kind: input, shape index: {}]   ;;  %s568_s3 = inlined_call_operand.vmem [shape: f32[3,8,128], index: 3, kind: output, shape index: {}]  }
   0x1 LB: > { %s514_s13 = sadd.s32 4294967295, %s483_s12   ;;  %p441_p0 = scmp.ge.s32.totalorder %s483_s12, 1  ;;  %s483_s12 = sphi %s508_s12, %s13_s12  }
   0x2   : > { %p149_p1 = scmp.lt.s32.totalorder %s483_s12, 4 }
   0x4   : > { %p150_p2 = pnand %p441_p0, %p149_p1 }
   0x5   : > { %s442_s14 = sshll.u32 (!%p150_p2), %s514_s13, 1  ;;  %s485_s22 = smov (!%p150_p2), 64  }
   0x6   : > { %153 = sbr.rel (%p150_p2) target bundleno = 790 (0x316), region = 32  ;;  %p178_p3 = scmp.lt.s32.totalorder (!%p150_p2), %s442_s14, 5 }
   0x7   : > { %s486_s23 = smov (!%p150_p2), 1   ;;  %s487_s24 = smov (!%p150_p2), 127  }
   0x8   : > { %p189_p4 = scmp.lt.s32.totalorder (!%p150_p2), %s514_s13, 2  ;;  %p447_p5 = scmp.ne.s32.totalorder (!%p150_p2), %s514_s13, 0 }
   0xb   : > { %s570_s14 = smov (!%p178_p3, %s442_s14), 5  ;;  %vm214_vm0 = vcmask 1048064   ;;  %vm201_vm1 = vcmask 523264   ;;  %v237_v23 = vlaneseq }
   0xc   : > { %s443_s15 = sshll.u32 %s570_s14, 3 }
   0xd   : > { %s181_s18 = scalar_lea.vmem %s565_s0, %s443_s15  ;;  %s187_s21 = scalar_lea.vmem %s566_s1, %s443_s15  ;;  %v525_v24 = vand.u32 127, %v237_v23  ;;  %v529_v48 = vshrl.u32 %v237_v23, 7 }
   0xe   : > { %v193_v0 = vld [vmem:[%s181_s18] sm:$0xff]  ;;  %v194_v3 = vld [vmem:[%s181_s18 + $0x8] sm:$0xff]  ;;  %s190_s25 = scalar_select %p189_p4, %s514_s13, 2 }
   0xf   : > { %v195_v1 = vld [vmem:[%s187_s21] sm:$0xff]  ;;  %v196_v4 = vld [vmem:[%s187_s21 + $0x8] sm:$0xff]  ;;  %vm239_vm2 = vcmp.lt.s32.totalorder %v525_v24, 63  ;;  %vm266_vm3 = vcmp.eq.s32.totalorder %v529_v48, 0  ;;  %vm267_vm4 = vcmp.eq.s32.totalorder %v525_v24, 0  ;;  %vm271_vm5 = vcmp.eq.s32.totalorder %v525_v24, 1 }
  0x10   : > { %v197_v2 = vsub.f32 %v193_v0, %v195_v1  ;;  %v198_v5 = vsub.f32 %v194_v3, %v196_v4  ;;  %s446_s27 = sshll.u32 %s190_s25, 3  ;;  %vm268_vm6 = vmand %vm266_vm3, %vm267_vm4 }
  0x11   : > { %vm272_vm7 = vmand %vm266_vm3, %vm271_vm5  ;;  %s542_s30 = scalar_lea.vmem %s568_s3, %s446_s27 }
  0x12   : > { %215 = vrot.lane.b32.xlu0 %v197_v2, %s485_s22  ;;  %229 = vrot.lane.b32.xlu2 %v197_v2, %s486_s23  ;;  %v199_v18 = vmul.f32 %v197_v2, %v197_v2  ;;  %v200_v19 = vmul.f32 %v198_v5, %v198_v5 }
  0x14   : > { %v202_v20 = vsel %vm201_vm1, %v199_v18, 0.0  ;;  %v203_v21 = vsel %vm201_vm1, %v200_v19, 0.0 }
  0x15   : > { %v204_v22 = vadd.f32 %v203_v21, %v202_v20 }
  0x1a   : > { %218 = vrot.lane.b32.xlu0 %v198_v5, %s485_s22  ;;  %231 = vrot.lane.b32.xlu2 %v198_v5, %s486_s23 }
  0x43   : > { %205 = vadd.xlane.f32.xlu2 %v204_v22 }
  0x6c   : > { %v230_v10 = vpop.permute.xlu2 %229 }
  0x74   : > { %v232_v14 = vpop.permute.xlu2 %231 }
  0x84   : > { %v216_v6 = vpop.permute.xlu0 %215 }
  0x85   : > { %v217_v7 = vsel %vm214_vm0, %v216_v6, %v197_v2 }
  0x86   : > { %221 = vrot.lane.b32.xlu1 %v217_v7, %s485_s22 }
  0x8c   : > { %v219_v8 = vpop.permute.xlu0 %218 }
  0x8d   : > { %v220_v9 = vsel %vm214_vm0, %v219_v8, %v198_v5 }
  0x8e   : > { %223 = vrot.lane.b32.xlu1 %v220_v9, %s485_s22 }
  0xb6   : > { %v206_v34 = vpop.xlane.xlu2 %205 }
  0xb7   : > { %v207_v35 = vrot.slane %v206_v34, 4 }
  0xb9   : > { %v208_v36 = vadd.f32 %v207_v35, %v206_v34 }
  0xbb   : > { %v209_v37 = vrot.slane %v208_v36, 2 }
  0xbd   : > { %v210_v38 = vadd.f32 %v209_v37, %v208_v36 }
  0xbf   : > { %v211_v39 = vrot.slane %v210_v38, 1 }
  0xc1   : > { %v212_v40 = vadd.f32 %v211_v39, %v210_v38 }
  0xc3   : > { %452 = vpush %v212_v40 }
  0xf4   : > { %s453_s26 = spop %452 }
  0xf5   : > { %v269_v49 = vstv %s453_s26 }
  0xf6   : > { %v270_v50 = vsel %vm268_vm6, %v269_v49, 0.0 }
  0xf8   : > { %v222_v11 = vpop.permute.xlu1 %221 }
  0xf9   : > { %v225_v12 = vsel %vm214_vm0, %v222_v11, %v197_v2 }
  0xfa   : > { %v235_v13 = vsub.f32 %v225_v12, %v230_v10 }
  0xfc   : > { %242 = vrot.lane.b32.xlu0 %v235_v13, %s487_s24 }
 0x100   : > { %v224_v15 = vpop.permute.xlu1 %223 }
 0x101   : > { %v226_v16 = vsel %vm214_vm0, %v224_v15, %v198_v5 }
 0x102   : > { %v236_v17 = vsub.f32 %v226_v16, %v232_v14 }
 0x104   : > { %244 = vrot.lane.b32.xlu1 %v236_v17, %s487_s24 }
 0x16e   : > { %v243_v25 = vpop.permute.xlu0 %242 }
 0x16f   : > { %v248_v26 = vsel %vm239_vm2, %v243_v25, 0.0 }
 0x170   : > { %v250_v27 = vmul.f32 %v248_v26, %v248_v26 }
 0x172   : > { %v252_v31 = vsel %vm201_vm1, %v250_v27, 0.0 }
 0x176   : > { %v245_v28 = vpop.permute.xlu1 %244 }
 0x177   : > { %v249_v29 = vsel %vm239_vm2, %v245_v28, 0.0 }
 0x178   : > { %v251_v30 = vmul.f32 %v249_v29, %v249_v29 }
 0x17a   : > { %v253_v32 = vsel %vm201_vm1, %v251_v30, 0.0 }
 0x17b   : > { %v254_v33 = vadd.f32 %v253_v32, %v252_v31 }
 0x17d   : > { %255 = vadd.xlane.f32.xlu0 %v254_v33 }
 0x1f0   : > { %v256_v41 = vpop.xlane.xlu0 %255 }
 0x1f1   : > { %v257_v42 = vrot.slane %v256_v41, 4 }
 0x1f3   : > { %v258_v43 = vadd.f32 %v257_v42, %v256_v41 }
 0x1f5   : > { %v259_v44 = vrot.slane %v258_v43, 2 }
 0x1f7   : > { %v260_v45 = vadd.f32 %v259_v44, %v258_v43 }
 0x1f9   : > { %v261_v46 = vrot.slane %v260_v45, 1 }
 0x1fb   : > { %v262_v47 = vadd.f32 %v261_v46, %v260_v45 }
 0x1fd   : > { %454 = vpush %v262_v47 }
 0x22d   : > { %279 = sbr.rel (%p447_p5) target bundleno = 790 (0x316), region = 36 }
 0x22e   : > { %s455_s4 = spop %454 }
 0x22f   : > { %v273_v51 = vstv %s455_s4 }
 0x230   : > { %v274_v52 = vsel %vm272_vm7, %v273_v51, %v270_v50 }
 0x231   : > { %275 = vst [vmem:[%s542_s30] sm:$0xff] %v274_v52 }
 0x232   : > { %v280_v53 = vld [vmem:[%s567_s2] sm:$0xff]  ;;  %vm328_vm8 = vcmask 1040384   ;;  %vm308_vm13 = vcmask 1042432   ;;  %vm357_vm14 = vcmp.eq.s32.totalorder %v525_v24, 2  ;;  %vm361_vm15 = vcmp.eq.s32.totalorder %v525_v24, 3 }
 0x233   : > { %v448_v54 = vmul.f32 -1.442695, %v280_v53  ;;  %v339_v55 = vrot.slane %v280_v53, 1  ;;  %v342_v56 = vrot.slane %v280_v53, 2  ;;  %v282_v2 = vrot.slane %v280_v53, 3  ;;  %vm358_vm1 = vmand %vm266_vm3, %vm357_vm14 }
 0x234   : > { %v319_v4 = vmul.f32 1.2, %v280_v53  ;;  %vm365_vm0 = vcmp.eq.s32.totalorder %v525_v24, 4  ;;  %vm362_vm2 = vmand %vm266_vm3, %vm361_vm15 }
 0x235   : > { %473 = vpow2.f32 %v448_v54  ;;  %v341_v57 = vadd.f32 %v339_v55, %v280_v53  ;;  %v284_v9 = vsub.f32 %v280_v53, %v282_v2  ;;  %vm366_vm4 = vmand %vm266_vm3, %vm365_vm0 }
 0x236   : > { %v321_v11 = vrot.slane %v319_v4, 1 }
 0x237   : > { %v344_v58 = vadd.f32 %v342_v56, %v341_v57  ;;  %v285_v14 = vmul.f32 %v284_v9, %v284_v9 }
 0x238   : > { %v323_v16 = vsub.f32 %v280_v53, %v321_v11  ;;  %v369_v49 = vld [vmem:[%s542_s30] sm:$0xff] }
 0x239   : > { %v449_v59 = vadd.f32 -60.0, %v344_v58 }
 0x23a   : > { %v324_v19 = vmax.f32 %v323_v16, 0.0 }
 0x23b   : > { %v474_v60 = vpop.eup %473  ;;  %v346_v61 = vmax.f32 %v449_v59, 0.0 }
 0x23c   : > { %v289_v62 = vadd.f32 1.0, %v474_v60  ;;  %v326_v21 = vrot.slane %v324_v19, 1 }
 0x23d   : > { %v347_v63 = vsel %vm328_vm8, %v346_v61, 0.0 }
 0x23e   : > { %475 = vrcp.f32 %v289_v62  ;;  %348 = vadd.xlane.f32.xlu1 %v347_v63  ;;  %v301_v3 = vand.u32 2147483648, %v289_v62  ;;  %vm295_vm9 = vweird.f32 %v289_v62  ;;  %v299_v6 = vand.u32 2147483647, %v289_v62 }
 0x23f   : > { %v329_v22 = vsel %vm328_vm8, %v326_v21, 0.0 }
 0x240   : > { %v302_v8 = vor.u32 1.1754944e-38, %v301_v3  ;;  %vm300_vm12 = vcmp.eq.f32.partialorder %v299_v6, 8.507059e+37 }
 0x244   : > { %v476_v0 = vpop.eup %475 }
 0x245   : > { %v291_v1 = vmul.f32 %v476_v0, %v289_v62  ;;  %vm296_vm10 = vweird.f32 %v476_v0 }
 0x246   : > { %vm297_vm11 = vmor %vm295_vm9, %vm296_vm10 }
 0x247   : > { %v292_v5 = vsub.f32 1.0, %v291_v1 }
 0x249   : > { %v293_v7 = vmul.f32 %v476_v0, %v292_v5 }
 0x24b   : > { %v294_v10 = vadd.f32 %v476_v0, %v293_v7 }
 0x24d   : > { %v298_v12 = vsel %vm297_vm11, %v476_v0, %v294_v10 }
 0x24e   : > { %v303_v13 = vsel %vm300_vm12, %v302_v8, %v298_v12 }
 0x24f   : > { %v305_v15 = vsub.f32 1.0, %v303_v13 }
 0x251   : > { %v306_v17 = vperm.slane %v305_v15, 6 }
 0x253   : > { %v307_v18 = vmul.f32 %v306_v17, %v285_v14 }
 0x255   : > { %v309_v20 = vsel %vm308_vm13, %v307_v18, 0.0 }
 0x256   : > { %310 = vadd.xlane.f32.xlu0 %v309_v20 }
 0x25e   : > { %330 = vadd.xlane.f32.xlu0 %v329_v22 }
 0x2b1   : > { %v349_v23 = vpop.xlane.xlu1 %348 }
 0x2b2   : > { %v350_v26 = vrot.slane %v349_v23, 4 }
 0x2b4   : > { %v351_v29 = vadd.f32 %v350_v26, %v349_v23 }
 0x2b6   : > { %v352_v32 = vrot.slane %v351_v29, 2 }
 0x2b8   : > { %v353_v38 = vadd.f32 %v352_v32, %v351_v29 }
 0x2ba   : > { %v354_v41 = vrot.slane %v353_v38, 1 }
 0x2bc   : > { %v355_v44 = vadd.f32 %v354_v41, %v353_v38 }
 0x2c9   : > { %v311_v25 = vpop.xlane.xlu0 %310 }
 0x2ca   : > { %v312_v27 = vrot.slane %v311_v25, 4 }
 0x2cc   : > { %v313_v28 = vadd.f32 %v312_v27, %v311_v25 }
 0x2ce   : > { %v314_v30 = vrot.slane %v313_v28, 2 }
 0x2d0   : > { %v315_v31 = vadd.f32 %v314_v30, %v313_v28 }
 0x2d1   : > { %v331_v33 = vpop.xlane.xlu0 %330 }
 0x2d2   : > { %v332_v34 = vrot.slane %v331_v33, 4  ;;  %v316_v35 = vrot.slane %v315_v31, 1 }
 0x2d4   : > { %v333_v36 = vadd.f32 %v332_v34, %v331_v33  ;;  %v317_v37 = vadd.f32 %v316_v35, %v315_v31 }
 0x2d6   : > { %v334_v39 = vrot.slane %v333_v36, 2  ;;  %456 = vpush %v317_v37 }
 0x2d8   : > { %v335_v40 = vadd.f32 %v334_v39, %v333_v36 }
 0x2da   : > { %v336_v42 = vrot.slane %v335_v40, 1 }
 0x2dc   : > { %v337_v43 = vadd.f32 %v336_v42, %v335_v40 }
 0x2de   : > { %458 = vpush %v337_v43 }
 0x2df   : > { %460 = vpush %v355_v44 }
 0x307   : > { %s457_s7 = spop %456 }
 0x308   : > { %v359_v45 = vstv %s457_s7 }
 0x309   : > { %v360_v46 = vsel %vm358_vm1, %v359_v45, 0.0 }
 0x30f   : > { %s459_s8 = spop %458 }
 0x310   : > { %v363_v47 = vstv %s459_s8  ;;  %s461_s9 = spop %460 }
 0x311   : > { %v364_v50 = vsel %vm362_vm2, %v363_v47, %v360_v46  ;;  %v367_v51 = vstv %s461_s9 }
 0x312   : > { %v368_v52 = vsel %vm366_vm4, %v367_v51, %v364_v50 }
 0x313   : > { %v370_v53 = vadd.f32 %v369_v49, %v368_v52 }
 0x315   : > { %371 = vst [vmem:[%s542_s30] sm:$0xff] %v370_v53 }
 0x316 PF: > { %s13_s12 = sadd.s32 1, %s483_s12  }
 0x317   : > { %p10_p6 = scmp.ge.s32.totalorder %s13_s12, 5  }
 0x319   :  { %12 = sbr.rel (!%p10_p6) target bundleno = 1 (0x1), region = 69 }

</bundles_post_ra>
